<compile_context>
chip_gen: v7x
topology: tpu7x:2x2x1
jax: 0.10.0
libtpu: 0.0.40
codegen_flags: <defaults>
</compile_context>

<pallas_src>
import math

import jax
import jax.numpy as jnp
from jax.experimental import pallas as pl
from jax.experimental.pallas import tpu as pltpu

STATE_DIM = 6
STATE_DIM_PAD = 8          # contraction dim padded to the 8-sublane tile
ACTION_DIM = 2
HIDDEN_DIM = 256
LOG_STD_MIN = -20.0
LOG_STD_MAX = 2.0
OUT_WIDTH = 8              # [ y_t(2) | tanh(mean)(2) | log_prob(1) | unused(3) ]


def _round_up(x, m):
    return ((x + m - 1) // m) * m


def _default_epilogue_dtype():
    """bf16 bias+ReLU epilogue on bf16-VPU chips (v6e/v7x); f32 on v5e."""
    try:
        kind = jax.devices()[0].device_kind.lower()
    except Exception:
        return jnp.bfloat16
    if ("v5 lite" in kind) or ("v5lite" in kind) or ("v5e" in kind):
        return jnp.float32
    return jnp.bfloat16


# ----------------------------- Pallas kernel -----------------------------

def policy_kernel(state_ref, noise_ref,
                  w1_ref, b1_ref, w2_ref, b2_ref, w3_ref, b3_ref,
                  wh_ref, bh_ref, out_ref):
    epi = b1_ref.dtype                       # epilogue dtype (bf16 or f32)

    # --- policy_net: 3x (Linear -> ReLU); matmuls in bf16, f32 accumulate ---
    x = state_ref[...].astype(jnp.bfloat16)                          # (TB, 8)
    acc = jnp.dot(x, w1_ref[...], preferred_element_type=jnp.float32)
    h = jnp.maximum(acc.astype(epi) + b1_ref[...], 0.0).astype(jnp.bfloat16)

    acc = jnp.dot(h, w2_ref[...], preferred_element_type=jnp.float32)
    h = jnp.maximum(acc.astype(epi) + b2_ref[...], 0.0).astype(jnp.bfloat16)

    acc = jnp.dot(h, w3_ref[...], preferred_element_type=jnp.float32)
    h = jnp.maximum(acc.astype(epi) + b3_ref[...], 0.0)              # (TB, H)

    # --- fused heads (f32): one matmul produces [mean | log_std] ---
    heads = jnp.dot(h.astype(jnp.float32), wh_ref[...],
                    preferred_element_type=jnp.float32) + bh_ref[...]
    mean = heads[:, :ACTION_DIM]
    log_std = jnp.clip(heads[:, ACTION_DIM:], LOG_STD_MIN, LOG_STD_MAX)
    std = jnp.exp(log_std)

    # --- reparameterized sample + tanh squash ---
    eps = noise_ref[...]                                             # (TB, A)
    x_t = mean + std * eps                                           # rsample()
    y_t = jnp.tanh(x_t)

    # --- Normal(mean, std).log_prob(x_t); (x_t - mean)/std == eps ---
    log_prob = -0.5 * eps * eps - log_std - 0.5 * math.log(2.0 * math.pi)

    # --- tanh change-of-variables: log_prob -= 2*(log2 - x_t - softplus(-2 x_t)) ---
    s = -2.0 * x_t
    softplus_s = jnp.maximum(s, 0.0) + jnp.log1p(jnp.exp(-jnp.abs(s)))
    log_prob = log_prob - 2.0 * (math.log(2.0) - x_t - softplus_s)
    lp = jnp.sum(log_prob, axis=-1, keepdims=True)                   # (TB, 1)

    # --- direct lane-slice stores into the packed (TB, 8) output block ---
    out_ref[:, 0:ACTION_DIM] = y_t
    out_ref[:, ACTION_DIM:2 * ACTION_DIM] = jnp.tanh(mean)
    out_ref[:, 2 * ACTION_DIM:2 * ACTION_DIM + 1] = lp
    # lanes [5:8] are scratch padding, never read by the wrapper.


# ----------------------------- wrapper -----------------------------

def prepare_params(params, epilogue_dtype=None):
    """One-time parameter prep (hoisted out of the per-call hot path)."""
    if epilogue_dtype is None:
        epilogue_dtype = _default_epilogue_dtype()
    w1, b1, w2, b2, w3, b3, wm, bm, ws, bs = params
    w1p = jnp.pad(w1, ((0, STATE_DIM_PAD - STATE_DIM), (0, 0))).astype(jnp.bfloat16)
    wh = jnp.concatenate([wm, ws], axis=1)                # (H, 2A) fused heads
    bh = jnp.concatenate([bm, bs], axis=1)                # (1, 2A)
    return (w1p, b1.astype(epilogue_dtype),
            w2.astype(jnp.bfloat16), b2.astype(epilogue_dtype),
            w3.astype(jnp.bfloat16), b3.astype(epilogue_dtype),
            wh, bh)


def _choose_tb(batch, tile_b):
    """Batch tile: multiple of 8 (256 for large B), grid >= 2 when batch > 256."""
    b8 = _round_up(batch, 8)
    if b8 <= 256:
        return b8                                   # single small tile
    half = _round_up(pl.cdiv(b8, 2), 256)           # >= 2 grid steps (v7x megacore)
    return max(256, min(tile_b, half))


def policy_forward(state, noise, prepared, *, tile_b=1024):
    """state: (B, STATE_DIM) f32, noise: (B, ACTION_DIM) f32 standard normal."""
    w1p, b1, w2b, b2, w3b, b3, wh, bh = prepared

    B = state.shape[0]
    TB = _choose_tb(B, tile_b)
    B_pad = _round_up(B, TB)
    state = jnp.pad(state, ((0, B_pad - B), (0, STATE_DIM_PAD - state.shape[1])))
    if B_pad != B:
        noise = jnp.pad(noise, ((0, B_pad - B), (0, 0)))
    grid = (B_pad // TB,)

    def batch_spec(feat):
        return pl.BlockSpec((TB, feat), lambda i: (i, 0))

    def const_spec(arr):
        # Constant index_map -> weight stays VMEM-resident across grid steps.
        return pl.BlockSpec(arr.shape, lambda i: (0,) * arr.ndim)

    packed = pl.pallas_call(
        policy_kernel,
        out_shape=jax.ShapeDtypeStruct((B_pad, OUT_WIDTH), jnp.float32),
        grid=grid,
        in_specs=[
            batch_spec(STATE_DIM_PAD),      # state (padded K=8)
            batch_spec(ACTION_DIM),         # noise
            const_spec(w1p), const_spec(b1),
            const_spec(w2b), const_spec(b2),
            const_spec(w3b), const_spec(b3),
            const_spec(wh), const_spec(bh),
        ],
        out_specs=batch_spec(OUT_WIDTH),
        compiler_params=pltpu.CompilerParams(dimension_semantics=("parallel",)),
    )(state, noise, w1p, b1, w2b, b2, w3b, b3, wh, bh)

    y_t = packed[:B, 0:ACTION_DIM]
    mean_action = packed[:B, ACTION_DIM:2 * ACTION_DIM]
    log_prob = packed[:B, 2 * ACTION_DIM:2 * ACTION_DIM + 1]
    return y_t, log_prob, mean_action


# ---------------- parameter init (matches the PyTorch module) ----------------

def _xavier_uniform(key, fan_in, fan_out, gain):
    bound = gain * math.sqrt(6.0 / (fan_in + fan_out))
    return jax.random.uniform(key, (fan_in, fan_out), jnp.float32, -bound, bound)


def _kaiming_uniform_linear(key, fan_in, fan_out):
    # PyTorch default nn.Linear init: U(-1/sqrt(fan_in), 1/sqrt(fan_in))
    bound = 1.0 / math.sqrt(fan_in)
    kw, kb = jax.random.split(key)
    w = jax.random.uniform(kw, (fan_in, fan_out), jnp.float32, -bound, bound)
    b = jax.random.uniform(kb, (1, fan_out), jnp.float32, -bound, bound)
    return w, b


def init_params(key):
    k1, k2, k3, k4, k5 = jax.random.split(key, 5)
    w1, b1 = _kaiming_uniform_linear(k1, STATE_DIM, HIDDEN_DIM)
    w2, b2 = _kaiming_uniform_linear(k2, HIDDEN_DIM, HIDDEN_DIM)
    w3, b3 = _kaiming_uniform_linear(k3, HIDDEN_DIM, HIDDEN_DIM)
    wm = _xavier_uniform(k4, HIDDEN_DIM, ACTION_DIM, 0.001)
    bm = jnp.zeros((1, ACTION_DIM), jnp.float32)
    ws = _xavier_uniform(k5, HIDDEN_DIM, ACTION_DIM, 0.001)
    bs = jnp.zeros((1, ACTION_DIM), jnp.float32)
    return (w1, b1, w2, b2, w3, b3, wm, bm, ws, bs)


# ---------------- pure-JAX f32 reference (module semantics) ----------------

def reference_forward(state, noise, params):
    w1, b1, w2, b2, w3, b3, wm, bm, ws, bs = params
    h = jnp.maximum(state @ w1 + b1, 0.0)
    h = jnp.maximum(h @ w2 + b2, 0.0)
    h = jnp.maximum(h @ w3 + b3, 0.0)
    mean = h @ wm + bm
    log_std = jnp.clip(h @ ws + bs, LOG_STD_MIN, LOG_STD_MAX)
    std = jnp.exp(log_std)
    x_t = mean + std * noise
    y_t = jnp.tanh(x_t)
    lp = -0.5 * ((x_t - mean) / std) ** 2 - log_std - 0.5 * math.log(2 * math.pi)
    lp = lp - 2.0 * (math.log(2.0) - x_t - jax.nn.softplus(-2.0 * x_t))
    return y_t, jnp.sum(lp, axis=-1, keepdims=True), jnp.tanh(mean)


if __name__ == "__main__":
    key = jax.random.PRNGKey(0)
    kp, ks, kn = jax.random.split(key, 3)

    B = 8
    params = init_params(kp)
    prepared = prepare_params(params)      # one-time: fuse heads, bf16 casts, K-pad
    state = jax.random.normal(ks, (B, STATE_DIM), jnp.float32)
    noise = jax.random.normal(kn, (B, ACTION_DIM), jnp.float32)  # rsample() noise

    fwd = jax.jit(policy_forward)
    y_t, log_prob, mean_action = fwd(state, noise, prepared)
    jax.block_until_ready((y_t, log_prob, mean_action))

    y_ref, lp_ref, ma_ref = reference_forward(state, noise, params)
    # Tolerances loosened slightly vs pure-f32: hidden matmuls/epilogues run in bf16.
    assert jnp.allclose(y_t, y_ref, atol=1e-3), "y_t mismatch"
    assert jnp.allclose(log_prob, lp_ref, atol=1e-2), "log_prob mismatch"
    assert jnp.allclose(mean_action, ma_ref, atol=1e-3), "mean_action mismatch"

    print("KERNEL_OK")
</pallas_src>

<mosaic_0001>
module attributes {stable_mosaic.version = 11 : i64} {
  func.func @policy_kernel(%arg0: i32, %arg1: memref<8x8xf32, #tpu.memory_space<vmem>>, %arg2: memref<8x2xf32, #tpu.memory_space<vmem>>, %arg3: memref<8x256xbf16, #tpu.memory_space<vmem>>, %arg4: memref<1x256xbf16, #tpu.memory_space<vmem>>, %arg5: memref<256x256xbf16, #tpu.memory_space<vmem>>, %arg6: memref<1x256xbf16, #tpu.memory_space<vmem>>, %arg7: memref<256x256xbf16, #tpu.memory_space<vmem>>, %arg8: memref<1x256xbf16, #tpu.memory_space<vmem>>, %arg9: memref<256x4xf32, #tpu.memory_space<vmem>>, %arg10: memref<1x4xf32, #tpu.memory_space<vmem>>, %arg11: memref<8x8xf32, #tpu.memory_space<vmem>>) attributes {dimension_semantics = [#tpu.dimension_semantics<parallel>], iteration_bounds = array<i64: 1>, scalar_prefetch = 0 : i64, scratch_operands = 0 : i64, tpu.core_type = #tpu.core_type<tc>, window_params = [{transform_indices = @transform_0, window_bounds = array<i64: 8, 8>}, {transform_indices = @transform_1, window_bounds = array<i64: 8, 2>}, {pipeline_mode = #tpu.pipeline_mode<synchronous>, transform_indices = @transform_2, window_bounds = array<i64: 8, 256>}, {pipeline_mode = #tpu.pipeline_mode<synchronous>, transform_indices = @transform_3, window_bounds = array<i64: 1, 256>}, {pipeline_mode = #tpu.pipeline_mode<synchronous>, transform_indices = @transform_4, window_bounds = array<i64: 256, 256>}, {pipeline_mode = #tpu.pipeline_mode<synchronous>, transform_indices = @transform_5, window_bounds = array<i64: 1, 256>}, {pipeline_mode = #tpu.pipeline_mode<synchronous>, transform_indices = @transform_6, window_bounds = array<i64: 256, 256>}, {pipeline_mode = #tpu.pipeline_mode<synchronous>, transform_indices = @transform_7, window_bounds = array<i64: 1, 256>}, {pipeline_mode = #tpu.pipeline_mode<synchronous>, transform_indices = @transform_8, window_bounds = array<i64: 256, 4>}, {pipeline_mode = #tpu.pipeline_mode<synchronous>, transform_indices = @transform_9, window_bounds = array<i64: 1, 4>}, {transform_indices = @transform_10, window_bounds = array<i64: 8, 8>}]} {
    %c0 = arith.constant 0 : index
    %c0_0 = arith.constant 0 : index
    %0 = vector.load %arg1[%c0, %c0_0] : memref<8x8xf32, #tpu.memory_space<vmem>>, vector<8x8xf32>
    %1 = arith.truncf %0 : vector<8x8xf32> to vector<8x8xbf16>
    %c0_1 = arith.constant 0 : index
    %c0_2 = arith.constant 0 : index
    %2 = vector.load %arg3[%c0_1, %c0_2] : memref<8x256xbf16, #tpu.memory_space<vmem>>, vector<8x256xbf16>
    %cst = arith.constant dense<0.000000e+00> : vector<8x256xf32>
    %3 = tpu.matmul %1, %2, %cst {dimension_numbers = #tpu.dot_dimension_numbers<[1], [0], [0], [1], [0, 0, 1, 1], [], []>} : vector<8x8xbf16>, vector<8x256xbf16>, vector<8x256xf32> -> vector<8x256xf32>
    %4 = arith.truncf %3 : vector<8x256xf32> to vector<8x256xbf16>
    %c0_3 = arith.constant 0 : index
    %c0_4 = arith.constant 0 : index
    %5 = vector.load %arg4[%c0_3, %c0_4] : memref<1x256xbf16, #tpu.memory_space<vmem>>, vector<1x256xbf16>
    %6 = vector.broadcast %5 : vector<1x256xbf16> to vector<8x256xbf16>
    %7 = arith.addf %4, %6 : vector<8x256xbf16>
    %cst_5 = arith.constant 0.000000e+00 : bf16
    %8 = vector.broadcast %cst_5 : bf16 to vector<8x256xbf16>
    %9 = arith.maximumf %7, %8 : vector<8x256xbf16>
    %c0_6 = arith.constant 0 : index
    %c0_7 = arith.constant 0 : index
    %10 = vector.load %arg5[%c0_6, %c0_7] : memref<256x256xbf16, #tpu.memory_space<vmem>>, vector<256x256xbf16>
    %cst_8 = arith.constant dense<0.000000e+00> : vector<8x256xf32>
    %11 = tpu.matmul %9, %10, %cst_8 {dimension_numbers = #tpu.dot_dimension_numbers<[1], [0], [0], [1], [0, 0, 1, 1], [], []>} : vector<8x256xbf16>, vector<256x256xbf16>, vector<8x256xf32> -> vector<8x256xf32>
    %12 = arith.truncf %11 : vector<8x256xf32> to vector<8x256xbf16>
    %c0_9 = arith.constant 0 : index
    %c0_10 = arith.constant 0 : index
    %13 = vector.load %arg6[%c0_9, %c0_10] : memref<1x256xbf16, #tpu.memory_space<vmem>>, vector<1x256xbf16>
    %14 = vector.broadcast %13 : vector<1x256xbf16> to vector<8x256xbf16>
    %15 = arith.addf %12, %14 : vector<8x256xbf16>
    %cst_11 = arith.constant 0.000000e+00 : bf16
    %16 = vector.broadcast %cst_11 : bf16 to vector<8x256xbf16>
    %17 = arith.maximumf %15, %16 : vector<8x256xbf16>
    %c0_12 = arith.constant 0 : index
    %c0_13 = arith.constant 0 : index
    %18 = vector.load %arg7[%c0_12, %c0_13] : memref<256x256xbf16, #tpu.memory_space<vmem>>, vector<256x256xbf16>
    %cst_14 = arith.constant dense<0.000000e+00> : vector<8x256xf32>
    %19 = tpu.matmul %17, %18, %cst_14 {dimension_numbers = #tpu.dot_dimension_numbers<[1], [0], [0], [1], [0, 0, 1, 1], [], []>} : vector<8x256xbf16>, vector<256x256xbf16>, vector<8x256xf32> -> vector<8x256xf32>
    %20 = arith.truncf %19 : vector<8x256xf32> to vector<8x256xbf16>
    %c0_15 = arith.constant 0 : index
    %c0_16 = arith.constant 0 : index
    %21 = vector.load %arg8[%c0_15, %c0_16] : memref<1x256xbf16, #tpu.memory_space<vmem>>, vector<1x256xbf16>
    %22 = vector.broadcast %21 : vector<1x256xbf16> to vector<8x256xbf16>
    %23 = arith.addf %20, %22 : vector<8x256xbf16>
    %cst_17 = arith.constant 0.000000e+00 : bf16
    %24 = vector.broadcast %cst_17 : bf16 to vector<8x256xbf16>
    %25 = arith.maximumf %23, %24 : vector<8x256xbf16>
    %26 = arith.extf %25 : vector<8x256xbf16> to vector<8x256xf32>
    %c0_18 = arith.constant 0 : index
    %c0_19 = arith.constant 0 : index
    %27 = vector.load %arg9[%c0_18, %c0_19] : memref<256x4xf32, #tpu.memory_space<vmem>>, vector<256x4xf32>
    %cst_20 = arith.constant dense<0.000000e+00> : vector<8x4xf32>
    %28 = tpu.matmul %26, %27, %cst_20 {dimension_numbers = #tpu.dot_dimension_numbers<[1], [0], [0], [1], [0, 0, 1, 1], [], []>} : vector<8x256xf32>, vector<256x4xf32>, vector<8x4xf32> -> vector<8x4xf32>
    %c0_21 = arith.constant 0 : index
    %c0_22 = arith.constant 0 : index
    %29 = vector.load %arg10[%c0_21, %c0_22] : memref<1x4xf32, #tpu.memory_space<vmem>>, vector<1x4xf32>
    %30 = vector.broadcast %29 : vector<1x4xf32> to vector<8x4xf32>
    %31 = arith.addf %28, %30 : vector<8x4xf32>
    %32 = vector.extract_strided_slice %31 {offsets = [0, 0], sizes = [8, 2], strides = [1, 1]} : vector<8x4xf32> to vector<8x2xf32>
    %33 = vector.extract_strided_slice %31 {offsets = [0, 2], sizes = [8, 2], strides = [1, 1]} : vector<8x4xf32> to vector<8x2xf32>
    %cst_23 = arith.constant -2.000000e+01 : f32
    %cst_24 = arith.constant 2.000000e+00 : f32
    %34 = vector.broadcast %cst_23 : f32 to vector<8x2xf32>
    %35 = arith.maximumf %34, %33 : vector<8x2xf32>
    %36 = vector.broadcast %cst_24 : f32 to vector<8x2xf32>
    %37 = arith.minimumf %36, %35 : vector<8x2xf32>
    %38 = math.exp %37 : vector<8x2xf32>
    %c0_25 = arith.constant 0 : index
    %c0_26 = arith.constant 0 : index
    %39 = vector.load %arg2[%c0_25, %c0_26] : memref<8x2xf32, #tpu.memory_space<vmem>>, vector<8x2xf32>
    %40 = arith.mulf %38, %39 : vector<8x2xf32>
    %41 = arith.addf %32, %40 : vector<8x2xf32>
    %42 = math.tanh %41 : vector<8x2xf32>
    %cst_27 = arith.constant -5.000000e-01 : f32
    %43 = vector.broadcast %cst_27 : f32 to vector<8x2xf32>
    %44 = arith.mulf %43, %39 : vector<8x2xf32>
    %45 = arith.mulf %44, %39 : vector<8x2xf32>
    %46 = arith.subf %45, %37 : vector<8x2xf32>
    %cst_28 = arith.constant 0.918938517 : f32
    %47 = vector.broadcast %cst_28 : f32 to vector<8x2xf32>
    %48 = arith.subf %46, %47 : vector<8x2xf32>
    %cst_29 = arith.constant -2.000000e+00 : f32
    %49 = vector.broadcast %cst_29 : f32 to vector<8x2xf32>
    %50 = arith.mulf %49, %41 : vector<8x2xf32>
    %cst_30 = arith.constant 0.000000e+00 : f32
    %51 = vector.broadcast %cst_30 : f32 to vector<8x2xf32>
    %52 = arith.maximumf %50, %51 : vector<8x2xf32>
    %53 = math.absf %50 : vector<8x2xf32>
    %cst_31 = arith.constant 0.000000e+00 : f32
    %54 = vector.broadcast %cst_31 : f32 to vector<8x2xf32>
    %55 = arith.subf %54, %53 : vector<8x2xf32>
    %56 = math.exp %55 : vector<8x2xf32>
    %57 = math.log1p %56 : vector<8x2xf32>
    %58 = arith.addf %52, %57 : vector<8x2xf32>
    %cst_32 = arith.constant 0.693147182 : f32
    %59 = vector.broadcast %cst_32 : f32 to vector<8x2xf32>
    %60 = arith.subf %59, %41 : vector<8x2xf32>
    %61 = arith.subf %60, %58 : vector<8x2xf32>
    %cst_33 = arith.constant 2.000000e+00 : f32
    %62 = vector.broadcast %cst_33 : f32 to vector<8x2xf32>
    %63 = arith.mulf %62, %61 : vector<8x2xf32>
    %64 = arith.subf %48, %63 : vector<8x2xf32>
    %cst_34 = arith.constant dense<0.000000e+00> : vector<8xf32>
    %65 = vector.multi_reduction <add>, %64, %cst_34 [1] : vector<8x2xf32> to vector<8xf32>
    %66 = vector.shape_cast %65 : vector<8xf32> to vector<8x1xf32>
    %c0_35 = arith.constant 0 : index
    %c0_36 = arith.constant 0 : index
    %67 = vector.load %arg11[%c0_35, %c0_36] : memref<8x8xf32, #tpu.memory_space<vmem>>, vector<8x2xf32>
    tpu.vector_store %arg11[%c0_35, %c0_36], %42 {strides = array<i32>} : memref<8x8xf32, #tpu.memory_space<vmem>>, vector<8x2xf32>,
    %68 = math.tanh %32 : vector<8x2xf32>
    %c0_37 = arith.constant 0 : index
    %c2 = arith.constant 2 : index
    %69 = vector.load %arg11[%c0_37, %c2] : memref<8x8xf32, #tpu.memory_space<vmem>>, vector<8x2xf32>
    tpu.vector_store %arg11[%c0_37, %c2], %68 {strides = array<i32>} : memref<8x8xf32, #tpu.memory_space<vmem>>, vector<8x2xf32>,
    %c0_38 = arith.constant 0 : index
    %c4 = arith.constant 4 : index
    %70 = vector.load %arg11[%c0_38, %c4] : memref<8x8xf32, #tpu.memory_space<vmem>>, vector<8x1xf32>
    tpu.vector_store %arg11[%c0_38, %c4], %66 {strides = array<i32>} : memref<8x8xf32, #tpu.memory_space<vmem>>, vector<8x1xf32>,
    return
  }
  func.func @transform_0(%arg0: i32) -> (i32, i32) {
    %c0_i32 = arith.constant 0 : i32
    %c0_i32_0 = arith.constant 0 : i32
    return %arg0, %c0_i32 : i32, i32
  }
  func.func @transform_1(%arg0: i32) -> (i32, i32) {
    %c0_i32 = arith.constant 0 : i32
    %c0_i32_0 = arith.constant 0 : i32
    return %arg0, %c0_i32 : i32, i32
  }
  func.func @transform_2(%arg0: i32) -> (i32, i32) {
    %c0_i32 = arith.constant 0 : i32
    %c0_i32_0 = arith.constant 0 : i32
    %c0_i32_1 = arith.constant 0 : i32
    return %c0_i32, %c0_i32_0 : i32, i32
  }
  func.func @transform_3(%arg0: i32) -> (i32, i32) {
    %c0_i32 = arith.constant 0 : i32
    %c0_i32_0 = arith.constant 0 : i32
    %c0_i32_1 = arith.constant 0 : i32
    return %c0_i32, %c0_i32_0 : i32, i32
  }
  func.func @transform_4(%arg0: i32) -> (i32, i32) {
    %c0_i32 = arith.constant 0 : i32
    %c0_i32_0 = arith.constant 0 : i32
    %c0_i32_1 = arith.constant 0 : i32
    return %c0_i32, %c0_i32_0 : i32, i32
  }
  func.func @transform_5(%arg0: i32) -> (i32, i32) {
    %c0_i32 = arith.constant 0 : i32
    %c0_i32_0 = arith.constant 0 : i32
    %c0_i32_1 = arith.constant 0 : i32
    return %c0_i32, %c0_i32_0 : i32, i32
  }
  func.func @transform_6(%arg0: i32) -> (i32, i32) {
    %c0_i32 = arith.constant 0 : i32
    %c0_i32_0 = arith.constant 0 : i32
    %c0_i32_1 = arith.constant 0 : i32
    return %c0_i32, %c0_i32_0 : i32, i32
  }
  func.func @transform_7(%arg0: i32) -> (i32, i32) {
    %c0_i32 = arith.constant 0 : i32
    %c0_i32_0 = arith.constant 0 : i32
    %c0_i32_1 = arith.constant 0 : i32
    return %c0_i32, %c0_i32_0 : i32, i32
  }
  func.func @transform_8(%arg0: i32) -> (i32, i32) {
    %c0_i32 = arith.constant 0 : i32
    %c0_i32_0 = arith.constant 0 : i32
    %c0_i32_1 = arith.constant 0 : i32
    return %c0_i32, %c0_i32_0 : i32, i32
  }
  func.func @transform_9(%arg0: i32) -> (i32, i32) {
    %c0_i32 = arith.constant 0 : i32
    %c0_i32_0 = arith.constant 0 : i32
    %c0_i32_1 = arith.constant 0 : i32
    return %c0_i32, %c0_i32_0 : i32, i32
  }
  func.func @transform_10(%arg0: i32) -> (i32, i32) {
    %c0_i32 = arith.constant 0 : i32
    %c0_i32_0 = arith.constant 0 : i32
    return %arg0, %c0_i32 : i32, i32
  }
}

</mosaic_0001>

<bundles_post_ra>
// kernel: policy_forward.1
= control target key start
LH: loop header
LB: loop body
LE: loop exit
PB: predicated region body
PF: predicated region fallthrough
CT: control target
= control target key end

     0   :  { %15 = vsyncpa [#allocation3], 0  ;;  %s1161_s13 = smov [#allocation2]   ;;  %s1489_s0 = inlined_call_operand.vmem [shape: f32[8,8], index: 0, kind: input, shape index: {}]   ;;  %s1490_s1 = inlined_call_operand.vmem [shape: f32[8,2], index: 1, kind: input, shape index: {}]   ;;  %s1491_s2 = inlined_call_operand.vmem [shape: bf16[8,256], index: 2, kind: input, shape index: {}]   ;;  %s1492_s3 = inlined_call_operand.vmem [shape: bf16[1,256], index: 3, kind: input, shape index: {}]   ;;  %s1493_s4 = inlined_call_operand.vmem [shape: bf16[256,256], index: 4, kind: input, shape index: {}]   ;;  %s1494_s5 = inlined_call_operand.vmem [shape: bf16[1,256], index: 5, kind: input, shape index: {}]   ;;  %s1495_s6 = inlined_call_operand.hbm [shape: bf16[256,256], index: 6, kind: input, shape index: {}]   ;;  %s1496_s7 = inlined_call_operand.vmem [shape: bf16[1,256], index: 7, kind: input, shape index: {}]   ;;  %s1497_s8 = inlined_call_operand.vmem [shape: f32[256,4], index: 8, kind: input, shape index: {}]   ;;  %s1498_s9 = inlined_call_operand.vmem [shape: f32[1,4], index: 9, kind: input, shape index: {}]   ;;  %s1499_s10 = inlined_call_operand.vmem [shape: f32[8,8], index: 10, kind: output, shape index: {}]  }
   0x1   :  { %s33_s14 = sshll.u32 %s1161_s13, 4  ;;  %s1137_s17 = scalar_lea.hbm %s1495_s6, 4096  ;;  %s34_s14 = int_to_ptr.vmem [resolvable:$true] %s33_s14 }
   0x2   :  { %p1138_p0 = scmp.ne.s32.totalorder %s1495_s6, %s1137_s17  ;;  %p1141_p1 = scmp.lt.u32.totalorder %s1137_s17, %s1495_s6 }
   0x4   :  { %p1143_p2 = pnand %p1141_p1, %p1138_p0 }
   0x6   :  { %1146 = shalt.err (!%p1143_p2)
}
   0x7   :  { %s1147_s22 = scalar_lea.vmem %s34_s14, 4096  ;;  %p1152_p4 = scmp.lt.s32.totalorder %s34_s14, %s34_s14 }
   0x8   :  { %p1148_p3 = scmp.ne.s32.totalorder %s34_s14, %s1147_s22  ;;  %p1153_p5 = scmp.lt.s32.totalorder %s1147_s22, %s1147_s22 }
   0xa   :  { %p1154_p6 = por %p1153_p5, %p1152_p4 }
   0xc   :  { %p1155_p7 = pnand %p1154_p6, %p1148_p3 }
   0xe   :  { %1158 = shalt.err (!%p1155_p7)
}
   0xf   :  { %s1162_s23 = smov 128   ;;  %s1163_s24 = smov 8  }
  0x10   :  { %39 = dma.hbm_to_vmem [thread:$0]  %s1495_s6, 4096, %s34_s14, [#allocation3], %s1162_s23, %s1162_s23, %s1163_s24  }
  0x11   :  { %1159 = dma.done.wait [#allocation3], 4096  }
  0x12   :  { %1160 = vsyncadd [#allocation3], 4294963200  ;;  %v1164_v0 = vmov 0   ;;  %v52_v1 = vld [vmem:[%s1491_s2] sm:$0xff]  ;;  %vm62_vm0 = vcmask 1043456   ;;  %vm58_vm1 = vcmask 64512  }
  0x13   :  { %101 = vmatprep.mubr.bf16.mxu0 %v1164_v0  ;;  %v50_v2 = vld [vmem:[%s1489_s0] sm:$0xff]  ;;  %v883_v3 = vcombine.high %v52_v1, %v52_v1  ;;  %v882_v4 = vcombine.low %v52_v1, %v52_v1  ;;  %v1034_v7 = vld [vmem:[%s1493_s4 + $0x14] ss:$8 sps:$4 sm:$0xff]   ;;  %v1036_v10 = vld [vmem:[%s1493_s4 + $0x10] ss:$8 sps:$4 sm:$0xff]   ;;  %s1166_s20 = smov 2  }
  0x14   :  { %v1031_v5 = vld [vmem:[%s1493_s4 + $0x4] ss:$8 sps:$4 sm:$0xff]   ;;  %v1033_v6 = vld [vmem:[%s1493_s4] ss:$8 sps:$4 sm:$0xff]   ;;  %v51_v9 = vpack.c.bf16 %v50_v2, %v50_v2  ;;  %v1040_v13 = vld [vmem:[%s1493_s4 + $0x34] ss:$8 sps:$4 sm:$0xff]  }
  0x15   :  { %884 = vmatprep.subr.msk.bf16.mxu0 %vm62_vm0, %v883_v3  ;;  %v64_v8 = vsel %vm62_vm0, %v882_v4, 0  ;;  %346 = vmatprep.subr.bf16.mxu1 %v1031_v5  ;;  %v1037_v11 = vld [vmem:[%s1493_s4 + $0x24] ss:$8 sps:$4 sm:$0xff]   ;;  %v1039_v12 = vld [vmem:[%s1493_s4 + $0x20] ss:$8 sps:$4 sm:$0xff]   ;;  %vm863_vm2 = vcmask 15360  }
  0x16   :  { %70 = vmatpush1.bf16.msra.mxu0 %v64_v8  ;;  %347 = vmatpush1.bf16.msra.mxu1 %v1033_v6  ;;  %v1042_v14 = vld [vmem:[%s1493_s4 + $0x30] ss:$8 sps:$4 sm:$0xff]   ;;  %v1043_v15 = vld [vmem:[%s1493_s4 + $0x44] ss:$8 sps:$4 sm:$0xff]   ;;  %v1045_v16 = vld [vmem:[%s1493_s4 + $0x40] ss:$8 sps:$4 sm:$0xff]   ;;  %v125_v6 = vlaneseq }
  0x17   :  { %348 = vmatprep.subr.bf16.mxu1 %v1034_v7  ;;  %v1046_v17 = vld [vmem:[%s1493_s4 + $0x54] ss:$8 sps:$4 sm:$0xff]   ;;  %v1048_v18 = vld [vmem:[%s1493_s4 + $0x50] ss:$8 sps:$4 sm:$0xff]   ;;  %v1049_v19 = vld [vmem:[%s1493_s4 + $0x64] ss:$8 sps:$4 sm:$0xff]  }
  0x18   :  { %v1051_v20 = vld [vmem:[%s1493_s4 + $0x60] ss:$8 sps:$4 sm:$0xff]   ;;  %v1052_v21 = vld [vmem:[%s1493_s4 + $0x74] ss:$8 sps:$4 sm:$0xff]   ;;  %v1054_v22 = vld [vmem:[%s1493_s4 + $0x70] ss:$8 sps:$4 sm:$0xff]  }
  0x19   :  { %885 = vmatmul.mubr.msk.bf16.vlgmr.msra.gmra.mrb[0].mxu0 %vm58_vm1, %v51_v9  ;;  %v1055_v23 = vld [vmem:[%s1493_s4 + $0x84] ss:$8 sps:$4 sm:$0xff]   ;;  %v1057_v24 = vld [vmem:[%s1493_s4 + $0x80] ss:$8 sps:$4 sm:$0xff]   ;;  %v1058_v25 = vld [vmem:[%s1493_s4 + $0x94] ss:$8 sps:$4 sm:$0xff]  }
  0x1a   :  { %349 = vmatpush1.bf16.msra.mxu1 %v1036_v10  ;;  %v1060_v26 = vld [vmem:[%s1493_s4 + $0x90] ss:$8 sps:$4 sm:$0xff]   ;;  %v1061_v27 = vld [vmem:[%s1493_s4 + $0xa4] ss:$8 sps:$4 sm:$0xff]   ;;  %v1063_v28 = vld [vmem:[%s1493_s4 + $0xa0] ss:$8 sps:$4 sm:$0xff]  }
  0x1b   :  { %350 = vmatprep.subr.bf16.mxu1 %v1037_v11  ;;  %v1064_v29 = vld [vmem:[%s1493_s4 + $0xb4] ss:$8 sps:$4 sm:$0xff]   ;;  %v1066_v30 = vld [vmem:[%s1493_s4 + $0xb0] ss:$8 sps:$4 sm:$0xff]   ;;  %v1067_v31 = vld [vmem:[%s1493_s4 + $0xc4] ss:$8 sps:$4 sm:$0xff]  }
  0x1c   :  { %v1069_v32 = vld [vmem:[%s1493_s4 + $0xc0] ss:$8 sps:$4 sm:$0xff]   ;;  %v1070_v33 = vld [vmem:[%s1493_s4 + $0xd4] ss:$8 sps:$4 sm:$0xff]   ;;  %v1072_v34 = vld [vmem:[%s1493_s4 + $0xd0] ss:$8 sps:$4 sm:$0xff]  }
  0x1d   :  { %v1073_v35 = vld [vmem:[%s1493_s4 + $0xe4] ss:$8 sps:$4 sm:$0xff]   ;;  %v1075_v36 = vld [vmem:[%s1493_s4 + $0xe0] ss:$8 sps:$4 sm:$0xff]   ;;  %v1076_v37 = vld [vmem:[%s1493_s4 + $0xf4] ss:$8 sps:$4 sm:$0xff]  }
  0x1e   :  { %351 = vmatpush1.bf16.msra.mxu1 %v1039_v12  ;;  %v1078_v38 = vld [vmem:[%s1493_s4 + $0xf0] ss:$8 sps:$4 sm:$0xff]   ;;  %v1079_v39 = vld [vmem:[#allocation2] ss:$8 sps:$4 sm:$0xff]   ;;  %v1081_v40 = vld [vmem:[#allocation2 + $0x4] ss:$8 sps:$4 sm:$0xff]  }
  0x1f   :  { %352 = vmatprep.subr.bf16.mxu1 %v1040_v13  ;;  %v1084_v41 = vld [vmem:[#allocation2 + $0x14] ss:$8 sps:$4 sm:$0xff]   ;;  %623 = vmatprep.subr.bf16.mxu0 %v1081_v40  ;;  %v1082_v42 = vld [vmem:[#allocation2 + $0x10] ss:$8 sps:$4 sm:$0xff]   ;;  %v1087_v43 = vld [vmem:[#allocation2 + $0x24] ss:$8 sps:$4 sm:$0xff]  }
  0x20   :  { %624 = vmatpush1.bf16.msra.mxu0 %v1079_v39  ;;  %v1085_v44 = vld [vmem:[#allocation2 + $0x20] ss:$8 sps:$4 sm:$0xff]   ;;  %v1090_v45 = vld [vmem:[#allocation2 + $0x34] ss:$8 sps:$4 sm:$0xff]   ;;  %v1088_v46 = vld [vmem:[#allocation2 + $0x30] ss:$8 sps:$4 sm:$0xff]  }
  0x21   :  { %625 = vmatprep.subr.bf16.mxu0 %v1084_v41  ;;  %v1093_v47 = vld [vmem:[#allocation2 + $0x44] ss:$8 sps:$4 sm:$0xff]   ;;  %v1091_v48 = vld [vmem:[#allocation2 + $0x40] ss:$8 sps:$4 sm:$0xff]   ;;  %v1096_v49 = vld [vmem:[#allocation2 + $0x54] ss:$8 sps:$4 sm:$0xff]  }
  0x22   :  { %353 = vmatpush1.bf16.msra.mxu1 %v1042_v14  ;;  %v1094_v50 = vld [vmem:[#allocation2 + $0x50] ss:$8 sps:$4 sm:$0xff]   ;;  %v1099_v51 = vld [vmem:[#allocation2 + $0x64] ss:$8 sps:$4 sm:$0xff]   ;;  %v1097_v52 = vld [vmem:[#allocation2 + $0x60] ss:$8 sps:$4 sm:$0xff]  }
  0x23   :  { %354 = vmatprep.subr.bf16.mxu1 %v1043_v15  ;;  %v1102_v53 = vld [vmem:[#allocation2 + $0x74] ss:$8 sps:$4 sm:$0xff]   ;;  %v1100_v54 = vld [vmem:[#allocation2 + $0x70] ss:$8 sps:$4 sm:$0xff]   ;;  %v1105_v55 = vld [vmem:[#allocation2 + $0x84] ss:$8 sps:$4 sm:$0xff]  }
  0x24   :  { %626 = vmatpush1.bf16.msra.mxu0 %v1082_v42  ;;  %v1103_v56 = vld [vmem:[#allocation2 + $0x80] ss:$8 sps:$4 sm:$0xff]   ;;  %v1108_v57 = vld [vmem:[#allocation2 + $0x94] ss:$8 sps:$4 sm:$0xff]   ;;  %v1106_v58 = vld [vmem:[#allocation2 + $0x90] ss:$8 sps:$4 sm:$0xff]  }
  0x25   :  { %627 = vmatprep.subr.bf16.mxu0 %v1087_v43  ;;  %v1111_v59 = vld [vmem:[#allocation2 + $0xa4] ss:$8 sps:$4 sm:$0xff]   ;;  %v1109_v60 = vld [vmem:[#allocation2 + $0xa0] ss:$8 sps:$4 sm:$0xff]   ;;  %v1114_v61 = vld [vmem:[#allocation2 + $0xb4] ss:$8 sps:$4 sm:$0xff]  }
  0x26   :  { %355 = vmatpush1.bf16.msra.mxu1 %v1045_v16  ;;  %v1112_v62 = vld [vmem:[#allocation2 + $0xb0] ss:$8 sps:$4 sm:$0xff]   ;;  %v1117_v63 = vld [vmem:[#allocation2 + $0xc4] ss:$8 sps:$4 sm:$0xff]   ;;  %v1115_v1 = vld [vmem:[#allocation2 + $0xc0] ss:$8 sps:$4 sm:$0xff]  }
  0x27   :  { %356 = vmatprep.subr.bf16.mxu1 %v1046_v17  ;;  %v1120_v2 = vld [vmem:[#allocation2 + $0xd4] ss:$8 sps:$4 sm:$0xff]   ;;  %v1118_v3 = vld [vmem:[#allocation2 + $0xd0] ss:$8 sps:$4 sm:$0xff]   ;;  %v1165_v4 = vmov 1966171168  }
  0x28   :  { %628 = vmatpush1.bf16.msra.mxu0 %v1085_v44  ;;  %v123_v5 = vunpack.c.l.s4 %v1165_v4  ;;  %v126_v8 = vshrl.u32 %v125_v6, 7  ;;  %v886_v9 = vld.sshfl [vmem:[%s1492_s3] sm:$0x11 pattern:$0x75316420]  ;;  %v729_v39 = vld [vmem:[%s1497_s8 + $0x98] sm:$0xff] }
  0x29   :  { %629 = vmatprep.subr.bf16.mxu0 %v1090_v45  ;;  %v121_v11 = vcombine.high %v886_v9, %v886_v9  ;;  %v712_v42 = vld [vmem:[%s1497_s8 + $0x10] sm:$0xff]  ;;  %v713_v43 = vld [vmem:[%s1497_s8 + $0x18] sm:$0xff]  ;;  %v730_v44 = vld [vmem:[%s1497_s8 + $0xa0] sm:$0xff]  ;;  %vm873_vm3 = vcmask 31760   ;;  %vm875_vm5 = vcmask 39968  }
  0x2a   :  { %357 = vmatpush1.bf16.msra.mxu1 %v1048_v18  ;;  %v124_v7 = vunpack.c.0.s8 %v123_v5  ;;  %v1345_v15 = vsub.s32 0, %v126_v8  ;;  %v731_v45 = vld [vmem:[%s1497_s8 + $0xa8] sm:$0xff] }
  0x2b   :  { %358 = vmatprep.subr.bf16.mxu1 %v1049_v19 }
  0x2c   :  { %630 = vmatpush1.bf16.msra.mxu0 %v1088_v46  ;;  %v1341_v10 = vsub.s32 %v124_v7, %v126_v8  ;;  %v996_v46 = vpack.c.bf16 %v713_v43, %v712_v42 }
  0x2d   :  { %631 = vmatprep.subr.bf16.mxu0 %v1093_v47  ;;  %v998_v47 = vpack.c.bf16 %v731_v45, %v730_v44 }
  0x2e   :  { %359 = vmatpush1.bf16.msra.mxu1 %v1051_v20  ;;  %v128_v12 = vrot.slane %v886_v9, %v1341_v10  ;;  %v135_v13 = vrot.slane %v121_v11, %v1341_v10 }
  0x2f   :  { %360 = vmatprep.subr.bf16.mxu1 %v1052_v21 }
  0x30   :  { %632 = vmatpush1.bf16.msra.mxu0 %v1091_v48  ;;  %v137_v14 = vpack.i.b16 %v128_v12, %v128_v12  ;;  %v144_v16 = vpack.i.b16 %v135_v13, %v135_v13  ;;  %v714_v48 = vld [vmem:[%s1497_s8 + $0x20] sm:$0xff] }
  0x31   :  { %633 = vmatprep.subr.bf16.mxu0 %v1096_v49  ;;  %v715_v49 = vld [vmem:[%s1497_s8 + $0x28] sm:$0xff] }
  0x32   :  { %361 = vmatpush1.bf16.msra.mxu1 %v1054_v22  ;;  %v142_v17 = vrot.slane %v137_v14, %v1345_v15  ;;  %v149_v19 = vrot.slane %v144_v16, %v1345_v15 }
  0x33   :  { %362 = vmatprep.subr.bf16.mxu1 %v1055_v23 }
  0x34   :  { %634 = vmatpush1.bf16.msra.mxu0 %v1094_v50  ;;  %v732_v50 = vld [vmem:[%s1497_s8 + $0xb0] sm:$0xff] }
  0x35   :  { %635 = vmatprep.subr.bf16.mxu0 %v1099_v51  ;;  %v733_v51 = vld [vmem:[%s1497_s8 + $0xb8] sm:$0xff] }
  0x36   :  { %363 = vmatpush1.bf16.msra.mxu1 %v1057_v24 }
  0x37   :  { %364 = vmatprep.subr.bf16.mxu1 %v1058_v25 }
  0x38   :  { %636 = vmatpush1.bf16.msra.mxu0 %v1097_v52  ;;  %v1000_v52 = vpack.c.bf16 %v715_v49, %v714_v48 }
  0x39   :  { %637 = vmatprep.subr.bf16.mxu0 %v1102_v53  ;;  %v1002_v53 = vpack.c.bf16 %v733_v51, %v732_v50 }
  0x3a   :  { %365 = vmatpush1.bf16.msra.mxu1 %v1060_v26 }
  0x3b   :  { %366 = vmatprep.subr.bf16.mxu1 %v1061_v27 }
  0x3c   :  { %638 = vmatpush1.bf16.msra.mxu0 %v1100_v54  ;;  %v716_v54 = vld [vmem:[%s1497_s8 + $0x30] sm:$0xff] }
  0x3d   :  { %639 = vmatprep.subr.bf16.mxu0 %v1105_v55  ;;  %v717_v55 = vld [vmem:[%s1497_s8 + $0x38] sm:$0xff] }
  0x3e   :  { %367 = vmatpush1.bf16.msra.mxu1 %v1063_v28 }
  0x3f   :  { %368 = vmatprep.subr.bf16.mxu1 %v1064_v29  ;;  %v1123_v29 = vld [vmem:[#allocation2 + $0xe4] ss:$8 sps:$4 sm:$0xff]  }
  0x40   :  { %640 = vmatpush1.bf16.msra.mxu0 %v1103_v56  ;;  %v734_v56 = vld [vmem:[%s1497_s8 + $0xc0] sm:$0xff] }
  0x41   :  { %641 = vmatprep.subr.bf16.mxu0 %v1108_v57  ;;  %v735_v57 = vld [vmem:[%s1497_s8 + $0xc8] sm:$0xff] }
  0x42   :  { %369 = vmatpush1.bf16.msra.mxu1 %v1066_v30  ;;  %v1121_v30 = vld [vmem:[#allocation2 + $0xe0] ss:$8 sps:$4 sm:$0xff]  }
  0x43   :  { %370 = vmatprep.subr.bf16.mxu1 %v1067_v31  ;;  %v1126_v31 = vld [vmem:[#allocation2 + $0xf4] ss:$8 sps:$4 sm:$0xff]  }
  0x44   :  { %642 = vmatpush1.bf16.msra.mxu0 %v1106_v58  ;;  %v1004_v58 = vpack.c.bf16 %v717_v55, %v716_v54 }
  0x45   :  { %643 = vmatprep.subr.bf16.mxu0 %v1111_v59  ;;  %v1006_v59 = vpack.c.bf16 %v735_v57, %v734_v56 }
  0x46   :  { %371 = vmatpush1.bf16.msra.mxu1 %v1069_v32  ;;  %v1124_v32 = vld [vmem:[#allocation2 + $0xf0] ss:$8 sps:$4 sm:$0xff]  }
  0x47   :  { %372 = vmatprep.subr.bf16.mxu1 %v1070_v33  ;;  %v726_v33 = vld [vmem:[%s1497_s8 + $0x80] sm:$0xff] }
  0x48   :  { %644 = vmatpush1.bf16.msra.mxu0 %v1109_v60  ;;  %v718_v60 = vld [vmem:[%s1497_s8 + $0x40] sm:$0xff] }
  0x49   :  { %645 = vmatprep.subr.bf16.mxu0 %v1114_v61  ;;  %v719_v61 = vld [vmem:[%s1497_s8 + $0x48] sm:$0xff] }
  0x4a   :  { %373 = vmatpush1.bf16.msra.mxu1 %v1072_v34  ;;  %v727_v34 = vld [vmem:[%s1497_s8 + $0x88] sm:$0xff] }
  0x4b   :  { %374 = vmatprep.subr.bf16.mxu1 %v1073_v35  ;;  %v710_v35 = vld [vmem:[%s1497_s8] sm:$0xff] }
  0x4c   :  { %646 = vmatpush1.bf16.msra.mxu0 %v1112_v62  ;;  %v736_v62 = vld [vmem:[%s1497_s8 + $0xd0] sm:$0xff] }
  0x4d   :  { %647 = vmatprep.subr.bf16.mxu0 %v1117_v63  ;;  %v737_v63 = vld [vmem:[%s1497_s8 + $0xd8] sm:$0xff] }
  0x4e   :  { %375 = vmatpush1.bf16.msra.mxu1 %v1075_v36  ;;  %v990_v36 = vpack.c.bf16 %v727_v34, %v726_v33  ;;  %v741_v33 = vld [vmem:[%s1497_s8 + $0xf8] sm:$0xff] }
  0x4f   :  { %376 = vmatprep.subr.bf16.mxu1 %v1076_v37  ;;  %v711_v37 = vld [vmem:[%s1497_s8 + $0x8] sm:$0xff] }
  0x50   :  { %648 = vmatpush1.bf16.msra.mxu0 %v1115_v1  ;;  %v992_v40 = vpack.c.bf16 %v711_v37, %v710_v35  ;;  %v1008_v1 = vpack.c.bf16 %v719_v61, %v718_v60  ;;  %v724_v35 = vld [vmem:[%s1497_s8 + $0x70] sm:$0xff] }
  0x51   :  { %649 = vmatprep.subr.bf16.mxu0 %v1120_v2  ;;  %v1010_v2 = vpack.c.bf16 %v737_v63, %v736_v62 }
  0x52   :  { %377 = vmatpush1.bf16.msra.mxu1 %v1078_v38  ;;  %v728_v38 = vld [vmem:[%s1497_s8 + $0x90] sm:$0xff] }
  0x53   :  { %v994_v41 = vpack.c.bf16 %v729_v39, %v728_v38  ;;  %991 = vmatprep.subr.bf16.mxu1 %v990_v36  ;;  %v725_v36 = vld [vmem:[%s1497_s8 + $0x78] sm:$0xff]  ;;  %v1459_v38 = vld [vmem:[%s1490_s1] sm:$0xff] }
  0x54   :  { %650 = vmatpush1.bf16.msra.mxu0 %v1118_v3  ;;  %v919_v3 = vld.sshfl [vmem:[%s1494_s5] sm:$0x11 pattern:$0x75316420]  ;;  %v1020_v37 = vpack.c.bf16 %v725_v36, %v724_v35  ;;  %825 = vrot.lane.b32.xlu0 %v1459_v38, %s1166_s20 }
  0x55   :  { %651 = vmatprep.subr.bf16.mxu0 %v1123_v29  ;;  %v398_v4 = vcombine.high %v919_v3, %v919_v3  ;;  %v405_v5 = vrot.slane %v919_v3, %v1341_v10  ;;  %v722_v29 = vld [vmem:[%s1497_s8 + $0x60] sm:$0xff] }
  0x56   :  { %v952_v39 = vld.sshfl [vmem:[%s1496_s7] sm:$0x11 pattern:$0x75316420] }
  0x57   :  { %v412_v6 = vrot.slane %v398_v4, %v1341_v10  ;;  %v414_v7 = vpack.i.b16 %v405_v5, %v405_v5 }
  0x58   :  { %652 = vmatpush1.bf16.msra.mxu0 %v1121_v30  ;;  %v723_v30 = vld [vmem:[%s1497_s8 + $0x68] sm:$0xff] }
  0x59   :  { %653 = vmatprep.subr.bf16.mxu0 %v1126_v31  ;;  %v421_v8 = vpack.i.b16 %v412_v6, %v412_v6  ;;  %v419_v9 = vrot.slane %v414_v7, %v1345_v15  ;;  %v1016_v31 = vpack.c.bf16 %v723_v30, %v722_v29 }
  0x5b   :  { %v426_v12 = vrot.slane %v421_v8, %v1345_v15 }
  0x5c   :  { %654 = vmatpush1.bf16.msra.mxu0 %v1124_v32  ;;  %v740_v32 = vld [vmem:[%s1497_s8 + $0xf0] sm:$0xff] }
  0x5d   :  { %v1018_v34 = vpack.c.bf16 %v741_v33, %v740_v32 }
  0xec   :  { %v103_v18 = vpop.f32.mrb[0].mxu0 }
  0xed   :  { %v110_v20 = vpack.c.bf16 %v103_v18, %v103_v18  ;;  %v105_v21 = vpop.f32.mrb[1].mxu0 }
  0xee   :  { %v111_v22 = vpack.c.bf16 %v105_v21, %v105_v21  ;;  %v107_v23 = vpop.f32.mrb[2].mxu0 }
  0xef   :  { %v150_v24 = vadd.bf16 %v142_v17, %v110_v20  ;;  %v108_v25 = vpop.f32.mrb[3].mxu0  ;;  %v720_v23 = vld [vmem:[%s1497_s8 + $0x50] sm:$0xff] }
  0xf0   :  { %v151_v26 = vadd.bf16 %v149_v19, %v111_v22 }
  0xf1   :  { %v152_v28 = vmax.bf16 %v1164_v0, %v150_v24  ;;  %v721_v24 = vld [vmem:[%s1497_s8 + $0x58] sm:$0xff] }
  0xf2   :  { %v153_v27 = vmax.bf16 %v1164_v0, %v151_v26  ;;  %v1012_v25 = vpack.c.bf16 %v721_v24, %v720_v23  ;;  %v738_v26 = vld [vmem:[%s1497_s8 + $0xe0] sm:$0xff] }
  0xf4   :  { %378 = vmatprep.mubr.bf16.mxu1 %v153_v27  ;;  %v739_v27 = vld [vmem:[%s1497_s8 + $0xe8] sm:$0xff]  ;;  %s1167_s8 = smov 126  }
  0xf5   :  { %379 = vmatmul.mubr.bf16.vlgmr.msra.gmra.mrb[0].mxu1 %v152_v28  ;;  %v1014_v28 = vpack.c.bf16 %v739_v27, %v738_v26 }
  0xf6   :  { %993 = vmatpush3.bf16.msra.mxu1 %v992_v40  ;;  %v675_v40 = vcombine.high %v952_v39, %v952_v39 }
  0xf7   :  { %995 = vmatprep.subr.bf16.mxu1 %v994_v41  ;;  %v682_v41 = vrot.slane %v952_v39, %v1341_v10 }
  0xf8   :  { %v689_v42 = vrot.slane %v675_v40, %v1341_v10 }
  0xf9   :  { %v691_v43 = vpack.i.b16 %v682_v41, %v682_v41 }
  0xfa   :  { %997 = vmatpush3.bf16.msra.mxu1 %v996_v46  ;;  %v698_v44 = vpack.i.b16 %v689_v42, %v689_v42 }
  0xfb   :  { %999 = vmatprep.subr.bf16.mxu1 %v998_v47  ;;  %v696_v45 = vrot.slane %v691_v43, %v1345_v15 }
  0xfc   :  { %v703_v47 = vrot.slane %v698_v44, %v1345_v15  ;;  %v953_v15 = vld [vmem:[%s1498_s9] ss:$0 sm:$0xff] }
  0xfe   :  { %1001 = vmatpush3.bf16.msra.mxu1 %v1000_v52 }
  0xff   :  { %1003 = vmatprep.subr.bf16.mxu1 %v1002_v53 }
 0x102   :  { %1005 = vmatpush3.bf16.msra.mxu1 %v1004_v58 }
 0x103   :  { %1007 = vmatprep.subr.bf16.mxu1 %v1006_v59 }
 0x106   :  { %1009 = vmatpush3.bf16.msra.mxu1 %v1008_v1 }
 0x107   :  { %1011 = vmatprep.subr.bf16.mxu1 %v1010_v2 }
 0x10a   :  { %1013 = vmatpush3.bf16.msra.mxu1 %v1012_v25 }
 0x10b   :  { %1015 = vmatprep.subr.bf16.mxu1 %v1014_v28 }
 0x10e   :  { %1017 = vmatpush3.bf16.msra.mxu1 %v1016_v31 }
 0x10f   :  { %1019 = vmatprep.subr.bf16.mxu1 %v1018_v34 }
 0x112   :  { %1021 = vmatpush3.bf16.msra.mxu1 %v1020_v37 }
 0x1c8   :  { %v380_v11 = vpop.f32.mrb[0].mxu1 }
 0x1c9   :  { %v387_v13 = vpack.c.bf16 %v380_v11, %v380_v11  ;;  %v382_v14 = vpop.f32.mrb[1].mxu1 }
 0x1ca   :  { %v388_v16 = vpack.c.bf16 %v382_v14, %v382_v14  ;;  %v384_v17 = vpop.f32.mrb[2].mxu1 }
 0x1cb   :  { %v427_v18 = vadd.bf16 %v419_v9, %v387_v13  ;;  %v385_v19 = vpop.f32.mrb[3].mxu1 }
 0x1cc   :  { %v428_v20 = vadd.bf16 %v426_v12, %v388_v16 }
 0x1cd   :  { %v429_v22 = vmax.bf16 %v1164_v0, %v427_v18  ;;  %v835_v18 = vmul.f32 -0.5, %v1459_v38 }
 0x1ce   :  { %v430_v21 = vmax.bf16 %v1164_v0, %v428_v20 }
 0x1d0   :  { %655 = vmatprep.mubr.bf16.mxu0 %v430_v21 }
 0x1d1   :  { %656 = vmatmul.mubr.bf16.vlgmr.msra.gmra.mrb[4].mxu0 %v429_v22  ;;  %v836_v22 = vmul.f32 %v835_v18, %v1459_v38 }
 0x2a4   :  { %v657_v46 = vpop.f32.mrb[4].mxu0 }
 0x2a5   :  { %v664_v48 = vpack.c.bf16 %v657_v46, %v657_v46  ;;  %v659_v49 = vpop.f32.mrb[5].mxu0 }
 0x2a6   :  { %v665_v50 = vpack.c.bf16 %v659_v49, %v659_v49  ;;  %v661_v51 = vpop.f32.mrb[6].mxu0 }
 0x2a7   :  { %v704_v52 = vadd.bf16 %v696_v45, %v664_v48  ;;  %v662_v53 = vpop.f32.mrb[7].mxu0 }
 0x2a8   :  { %v705_v54 = vadd.bf16 %v703_v47, %v665_v50 }
 0x2a9   :  { %v706_v55 = vmax.bf16 %v1164_v0, %v704_v52 }
 0x2aa   :  { %v707_v56 = vmax.bf16 %v1164_v0, %v705_v54  ;;  %v826_v0 = vpop.permute.xlu0 %825 }
 0x2ab   :  { %v708_v10 = vunpack.c.l.bf16 %v706_v55 }
 0x2ac   :  { %v709_v57 = vunpack.c.l.bf16 %v707_v56 }
 0x2ae   :  { %813 = vmatprep.mubr.f32.mxu1 %v709_v57 }
 0x2af   :  { %814 = vmatmul.mubr.f32.vlgmr.msra.gmra.mrb[4].mxu1 %v708_v10 }
 0x382   :  { %v987_v58 = vpop.f32.mrb[4].mxu1 }
 0x383   :  { %v988_v59 = vpop.f32.mrb[5].mxu1 }
 0x384   :  { %v989_v60 = vadd.f32 %v988_v59, %v987_v58 }
 0x386   :  { %v816_v61 = vadd.f32 %v989_v60, %v953_v15 }
 0x388   :  { %v819_v62 = vmax.f32 %v816_v61, -20.0 }
 0x38a   :  { %v820_v63 = vmin.f32 %v819_v62, 2.0 }
 0x38c   :  { %838 = vrot.lane.b32.xlu1 %v820_v63, %s1167_s8  ;;  %v821_v1 = vmul.f32 1.442695, %v820_v63 }
 0x38e   :  { %1127 = vpow2.f32 %v821_v1 }
 0x38f   :  { %1129 = vtanh.f32 %v816_v61 }
 0x398   :  { %v1128_v2 = vpop.eup %1127 }
 0x399   :  { %v828_v3 = vmul.f32 %v1128_v2, %v826_v0  ;;  %v1130_v4 = vpop.eup %1129 }
 0x39b   :  { %830 = vrot.lane.b32.xlu0 %v828_v3, %s1167_s8 }
 0x39f   :  { %870 = vrot.lane.b32.xlu0 %v1130_v4, %s1166_s20 }
 0x3fe   :  { %v839_v23 = vpop.permute.xlu1 %838 }
 0x3ff   :  { %v841_v28 = vsub.f32 %v836_v22, %v839_v23 }
 0x401   :  { %v954_v32 = vadd.f32 -0.9189385, %v841_v28 }
 0x40d   :  { %v831_v5 = vpop.permute.xlu0 %830 }
 0x40e   :  { %v833_v6 = vadd.f32 %v831_v5, %v816_v61 }
 0x410   :  { %1131 = vtanh.f32 %v833_v6  ;;  %v843_v7 = vmul.f32 -2.0, %v833_v6  ;;  %v859_v29 = vsub.f32 0.6931472, %v833_v6 }
 0x411   :  { %v871_v13 = vpop.permute.xlu0 %870 }
 0x412   :  { %v845_v8 = vand.u32 2147483647, %v843_v7  ;;  %v844_v26 = vmax.f32 %v843_v7, 0.0 }
 0x414   :  { %v846_v9 = vsub.f32 0.0, %v845_v8 }
 0x416   :  { %v847_v11 = vmul.f32 1.442695, %v846_v9 }
 0x418   :  { %1133 = vpow2.f32 %v847_v11 }
 0x41a   :  { %v1132_v12 = vpop.eup %1131 }
 0x41b   :  { %867 = vst.msk [vmem:[%s1499_s10] sm:$0xff] %vm863_vm2, %v1132_v12 }
 0x41c   :  { %874 = vst.msk [vmem:[%s1499_s10] sm:$0xff] %vm873_vm3, %v871_v13 }
 0x422   :  { %v1134_v14 = vpop.eup %1133 }
 0x423   :  { %v849_v16 = vadd.f32 1.0, %v1134_v14  ;;  %v852_v17 = vmul.f32 -0.5, %v1134_v14  ;;  %v855_v20 = vand.u32 2147483647, %v1134_v14 }
 0x425   :  { %1135 = vlog2.f32 %v849_v16  ;;  %v853_v19 = vadd.f32 1.0, %v852_v17  ;;  %vm856_vm4 = vcmp.lt.f32.partialorder %v855_v20, 0.0004427343 }
 0x427   :  { %v854_v25 = vmul.f32 %v1134_v14, %v853_v19 }
 0x42f   :  { %v1136_v21 = vpop.eup %1135 }
 0x430   :  { %v851_v24 = vmul.f32 0.6931472, %v1136_v21 }
 0x432   :  { %v857_v27 = vsel %vm856_vm4, %v854_v25, %v851_v24 }
 0x433   :  { %v858_v30 = vadd.f32 %v857_v27, %v844_v26 }
 0x435   :  { %v860_v31 = vsub.f32 %v859_v29, %v858_v30 }
 0x437   :  { %v861_v33 = vmul.f32 2.0, %v860_v31 }
 0x439   :  { %v862_v34 = vsub.f32 %v954_v32, %v861_v33 }
 0x43b   :  { %v864_v35 = vsel %vm863_vm2, %v862_v34, 0.0 }
 0x43c   :  { %865 = vadd.xlane.f32.xlu1 %v864_v35 }
 0x4c9   :  { %v866_v36 = vpop.xlane.xlu1 %865 }
 0x4ca   :  { %876 = vst.msk [vmem:[%s1499_s10] sm:$0xff] %vm875_vm5, %v866_v36 }
 0x4cb   :  { %881 = vsyncpa [#allocation3], 1 }

</bundles_post_ra>
